<compile_context>
chip_gen: v5e
topology: v5e:2x2
jax: 0.10.0
libtpu: 0.0.40
codegen_flags: <defaults>
</compile_context>

<pallas_src>
import jax
import jax.numpy as jnp
import numpy as np
from jax.experimental import pallas as pl
from jax.experimental.pallas import tpu as pltpu


_NCORES = 2                        # v7x has 2 TensorCores/chip; collapsed to 1 for tiny inputs
_TARGET_MEL_BLOCK_BYTES = 2 << 20  # ~2 MiB per mel input block (x2 inputs x2 buffers = 8 MiB)
_MAX_MEL_TILE_T = 2048             # lanes


def _round_up(x, m):
    return ((x + m - 1) // m) * m


def _cdiv(a, b):
    return (a + b - 1) // b


def _vmem_padded_bytes(shape, dtype):
    """Conservative VMEM footprint of one buffer holding `shape` of `dtype`."""
    if len(shape) == 1:
        r, c = 1, int(shape[0])
    else:
        r, c = int(np.prod(shape[:-1])), int(shape[-1])
    r_pad = _round_up(max(r, 1), 8)
    c_pad = _round_up(max(c, 1), 128)
    return r_pad * c_pad * max(2, int(jnp.dtype(dtype).itemsize))


# ---------------------------------------------------------------------------
# Kernel factory (all weights / flags / extents are static Python closure values).
# ---------------------------------------------------------------------------
def _build_kernel(*, batch_size, n_rows, n_cols, rows_per_core, tile_t,
                  need_row_mask, need_col_mask,
                  dur_w, energy_w, pitch_w, mel_w, speaker_w,
                  post_w, emo_w, use_emo, use_post):
    B = batch_size

    def kernel(seq_p_ref, seq_t_ref, seq_w_ref,
               spk_logits_ref, spk_ids_ref,
               emo_logits_ref, emo_ids_ref,
               post_ref,
               mel_p_ref, mel_t_ref, mel_w_ref,
               out_ref,
               l1_acc, l2_acc):
        core = pl.program_id(0)
        k = pl.program_id(1)
        nk = pl.num_programs(1)

        @pl.when(k == 0)
        def _init():
            l1_acc[...] = jnp.zeros_like(l1_acc)
            l2_acc[...] = jnp.zeros_like(l2_acc)

        # ---- hot path: single pass over the mel diff tile feeds both L1 & L2 ----
        d = mel_p_ref[...].astype(jnp.float32) - mel_t_ref[...].astype(jnp.float32)
        if need_row_mask or need_col_mask:
            # Edge blocks overhang the (un-padded) mel arrays; mask the undefined
            # out-of-bounds lanes/sublanes so they contribute exactly zero.
            ok = None
            if need_row_mask:
                row = (jax.lax.broadcasted_iota(jnp.int32, d.shape, 0)
                       + core * rows_per_core)
                ok = row < n_rows
            if need_col_mask:
                col = jax.lax.broadcasted_iota(jnp.int32, d.shape, 1) + k * tile_t
                cm = col < n_cols
                ok = cm if ok is None else (ok & cm)
            d = jnp.where(ok, d, 0.0)
        l1_acc[...] += jnp.sum(jnp.abs(d), axis=1, keepdims=True)
        l2_acc[...] += jnp.sum(d * d, axis=1, keepdims=True)

        @pl.when(k == nk - 1)
        def _finalize():
            is_core0 = (core == 0).astype(jnp.float32)
            inv_b = 1.0 / B

            # duration / energy / pitch MSE from one stacked [3B, L] diff
            sd = seq_p_ref[...] - seq_t_ref[...]
            per_row = jnp.sum(sd * sd, axis=1, keepdims=True) * seq_w_ref[...]
            row = jax.lax.broadcasted_iota(jnp.int32, per_row.shape, 0)
            dur_loss = dur_w * jnp.sum(jnp.where(row < B, per_row, 0.0)) * is_core0
            en_loss = energy_w * jnp.sum(
                jnp.where((row >= B) & (row < 2 * B), per_row, 0.0)) * is_core0
            pi_loss = pitch_w * jnp.sum(
                jnp.where(row >= 2 * B, per_row, 0.0)) * is_core0

            # stable cross entropy (mean reduction) via logsumexp + one-hot gather
            def cross_entropy(logits_ref, ids_ref):
                logits = logits_ref[...].astype(jnp.float32)
                m = jnp.max(logits, axis=1, keepdims=True)
                lse = jnp.log(jnp.sum(jnp.exp(logits - m), axis=1, keepdims=True)) + m
                col = jax.lax.broadcasted_iota(jnp.int32, logits.shape, 1)
                onehot = (col == ids_ref[...]).astype(jnp.float32)
                picked = jnp.sum(onehot * logits, axis=1, keepdims=True)
                return jnp.sum(lse - picked) * inv_b

            spk_loss = speaker_w * cross_entropy(spk_logits_ref, spk_ids_ref) * is_core0

            if use_emo:
                emo_loss = emo_w * cross_entropy(emo_logits_ref, emo_ids_ref) * is_core0
            else:
                emo_loss = 0.0 * is_core0

            if use_post:
                pm = post_ref[...].astype(jnp.float32)
                post_loss = post_w * jnp.sqrt(jnp.sum(pm * pm)) * is_core0
            else:
                post_loss = 0.0 * is_core0

            # finalize the mel partials for this core's row slice
            w_rows = mel_w_ref[...]                       # [R_half, 1], 1/(B*C*out_len)
            mel_l1 = mel_w * jnp.sum(l1_acc[...] * w_rows)
            mel_l2 = mel_w * jnp.sum(l2_acc[...] * w_rows)

            total = (spk_loss + post_loss + dur_loss + en_loss + pi_loss
                     + mel_l1 + mel_l2 + emo_loss)

            out_ref[0, 0] = spk_loss
            out_ref[0, 1] = post_loss
            out_ref[0, 2] = dur_loss
            out_ref[0, 3] = en_loss
            out_ref[0, 4] = pi_loss
            out_ref[0, 5] = mel_l1
            out_ref[0, 6] = mel_l2
            out_ref[0, 7] = emo_loss
            out_ref[0, 8] = total

    return kernel


# ---------------------------------------------------------------------------
# Wrapper module (JAX glue only; all hot-path reductions are in the kernel).
# ---------------------------------------------------------------------------
class DaftExprtLoss:
    def __init__(self, hparams, mel_tile_override=None):
        self.hp = hparams
        self._mel_tile_override = mel_tile_override   # test hook

    def update_adversarial_weight(self, iteration):
        hp = self.hp
        weight_iter = (iteration * hp["warmup_steps"] ** (-1.5)
                       * hp["adv_max_weight"] / hp["warmup_steps"] ** (-0.5))
        return min(hp["adv_max_weight"], weight_iter)

    def __call__(self, outputs, targets, iteration):
        (duration_targets, energy_targets, pitch_targets, mel_spec_targets,
         speaker_ids, _emotions, mapped_emotions) = targets
        (speaker_preds, film_params, encoder_preds, decoder_preds,
         _prosody_embeds, emotion_preds) = outputs
        post_multipliers = film_params
        duration_preds, energy_preds, pitch_preds, input_lengths = encoder_preds
        mel_spec_preds, output_lengths = decoder_preds

        hp = self.hp
        B, C, T = mel_spec_preds.shape
        assert C == hp["n_mel_channels"]
        use_emo = bool(hp["use_emotion_classifier"])
        use_post = float(hp["post_mult_weight"]) != 0.0

        # --------------------- mel layout: [B*C, T] tiles (NO hbm pad copy) -----
        R = B * C
        itemsize = int(jnp.dtype(mel_spec_preds.dtype).itemsize)

        ncores = _NCORES if R >= 8 * _NCORES else 1
        R_half = _round_up(_cdiv(R, ncores), 8)        # rows per core block (mult of 8)
        R_total = ncores * R_half
        need_row_mask = (R_total != R)

        # adaptive T tile: multiple of 128, sized so each block is ~2 MiB
        if self._mel_tile_override is not None:
            tile_t = max(128, (int(self._mel_tile_override) // 128) * 128)
        else:
            tile_t = _TARGET_MEL_BLOCK_BYTES // max(1, R_half * itemsize)
            tile_t = max(128, min(_MAX_MEL_TILE_T, (tile_t // 128) * 128))
        if tile_t >= T:
            tile_t = T                                  # single full-width block
            KT = 1
            need_col_mask = False
        else:
            KT = _cdiv(T, tile_t)
            need_col_mask = (KT * tile_t != T)

        mel_p2 = mel_spec_preds.reshape(R, T)          # free reshape, native dtype
        mel_t2 = mel_spec_targets.reshape(R, T)

        # per-row weight 1/(B * C * out_len[b]) broadcast over the C channel rows;
        # zero for the padded rows (tiny array, negligible pad cost).
        mel_row_w = jnp.repeat(
            1.0 / (float(B) * float(C) * output_lengths.astype(jnp.float32)), C)
        if R_total != R:
            mel_row_w = jnp.pad(mel_row_w, (0, R_total - R))
        mel_row_w = mel_row_w.reshape(R_total, 1)

        # ----------------- stacked duration / energy / pitch ------------------
        seq_p = jnp.concatenate(
            [duration_preds, energy_preds, pitch_preds], axis=0).astype(jnp.float32)
        seq_t = jnp.concatenate(
            [duration_targets, energy_targets, pitch_targets], axis=0).astype(jnp.float32)
        inv_in = (1.0 / (float(B) * input_lengths.astype(jnp.float32))).reshape(B, 1)
        seq_w = jnp.concatenate([inv_in, inv_in, inv_in], axis=0)       # [3B, 1]

        spk_logits = speaker_preds.astype(jnp.float32)
        spk_ids = speaker_ids.astype(jnp.int32).reshape(B, 1)
        if use_emo:
            emo_logits = emotion_preds.astype(jnp.float32)
            emo_ids = mapped_emotions.astype(jnp.int32).reshape(B, 1)
        else:
            emo_logits = jnp.zeros((B, 8), jnp.float32)
            emo_ids = jnp.zeros((B, 1), jnp.int32)
        post_mult = post_multipliers.astype(jnp.float32)
        if post_mult.ndim == 1:
            post_mult = post_mult.reshape(1, -1)
        elif post_mult.ndim > 2:
            post_mult = post_mult.reshape(post_mult.shape[0], -1)

        speaker_weight = float(self.update_adversarial_weight(iteration))
        kernel = _build_kernel(
            batch_size=B,
            n_rows=R,
            n_cols=T,
            rows_per_core=R_half,
            tile_t=tile_t,
            need_row_mask=need_row_mask,
            need_col_mask=need_col_mask,
            dur_w=float(hp["dur_weight"]),
            energy_w=float(hp["energy_weight"]),
            pitch_w=float(hp["pitch_weight"]),
            mel_w=float(hp["mel_spec_weight"]),
            speaker_w=speaker_weight,
            post_w=float(hp["post_mult_weight"]),
            emo_w=float(hp["emotion_classifier_loss"]) if use_emo else 0.0,
            use_emo=use_emo,
            use_post=use_post,
        )

        small_args = (seq_p, seq_t, seq_w, spk_logits, spk_ids,
                      emo_logits, emo_ids, post_mult)
        args = small_args + (mel_p2, mel_t2, mel_row_w)

        def _full(c, k):
            return (0, 0)

        in_specs = [pl.BlockSpec(a.shape, _full) for a in small_args] + [
            pl.BlockSpec((R_half, tile_t), lambda c, k: (c, k)),
            pl.BlockSpec((R_half, tile_t), lambda c, k: (c, k)),
            pl.BlockSpec((R_half, 1), lambda c, k: (c, 0)),
        ]
        out_spec = pl.BlockSpec((1, 9), lambda c, k: (c, 0),
                                memory_space=pltpu.MemorySpace.SMEM)

        # VMEM budget: 2 mel inputs x 2 pipeline buffers + small blocks + scratch
        mel_block_bytes = _vmem_padded_bytes((R_half, tile_t), mel_p2.dtype)
        small_bytes = sum(_vmem_padded_bytes(a.shape, a.dtype) for a in small_args)
        w_block_bytes = _vmem_padded_bytes((R_half, 1), jnp.float32)
        scratch_bytes = 2 * _vmem_padded_bytes((R_half, 1), jnp.float32)
        vmem_needed = (4 * mel_block_bytes + 2 * small_bytes + 2 * w_block_bytes
                       + scratch_bytes)
        vmem_limit = int(min(max(int(vmem_needed * 1.3) + (2 << 20), 8 << 20),
                             64 << 20))

        cost = pl.CostEstimate(
            flops=int(6 * R * T + 4 * seq_p.size + 4 * spk_logits.size
                      + 4 * emo_logits.size + 2 * post_mult.size),
            transcendentals=int(spk_logits.size + emo_logits.size + 1),
            bytes_accessed=int(2 * R * T * itemsize + small_bytes
                               + ncores * 9 * 4),
        )

        out = pl.pallas_call(
            kernel,
            grid=(ncores, KT),
            in_specs=in_specs,
            out_specs=out_spec,
            out_shape=jax.ShapeDtypeStruct((ncores, 9), jnp.float32),
            scratch_shapes=[pltpu.VMEM((R_half, 1), jnp.float32),
                            pltpu.VMEM((R_half, 1), jnp.float32)],
            compiler_params=pltpu.CompilerParams(
                dimension_semantics=("parallel", "arbitrary"),
                vmem_limit_bytes=vmem_limit),
            cost_estimate=cost,
        )(*args)

        vals = jnp.sum(out, axis=0)   # combine the per-TensorCore partials
        individual_loss = {
            "speaker_loss": vals[0],
            "post_mult_loss": vals[1],
            "duration_loss": vals[2],
            "energy_loss": vals[3],
            "pitch_loss": vals[4],
            "mel_spec_l1_loss": vals[5],
            "mel_spec_l2_loss": vals[6],
            "contrastive_loss": 0.0,   # see TODO(synk) at top of file
            "emotion_classifier_loss": vals[7],
        }
        return vals[8], individual_loss


# ---------------------------------------------------------------------------
# Pure-JAX reference (mirrors the PyTorch forward exactly) for verification.
# ---------------------------------------------------------------------------
def _reference_loss(outputs, targets, iteration, hp):
    (dur_t, en_t, pi_t, mel_t, spk_ids, _emotions, mapped_emotions) = targets
    (spk_logits, post_mult, enc_preds, dec_preds, _pros, emo_logits) = outputs
    dur_p, en_p, pi_p, in_len = enc_preds
    mel_p, out_len = dec_preds
    C = hp["n_mel_channels"]

    def ce(logits, ids):
        lse = jax.scipy.special.logsumexp(logits, axis=1)
        picked = logits[jnp.arange(logits.shape[0]), ids]
        return jnp.mean(lse - picked)

    speaker_loss = ce(spk_logits, spk_ids)
    emotion_loss = ce(emo_logits, mapped_emotions) if hp["use_emotion_classifier"] else 0.0
    post_mult_loss = jnp.sqrt(jnp.sum(post_mult ** 2))

    def seq_mse(p, t, lens):
        return jnp.mean(jnp.sum((p - t) ** 2, axis=1) / lens)

    duration_loss = seq_mse(dur_p, dur_t, in_len)
    energy_loss = seq_mse(en_p, en_t, in_len)
    pitch_loss = seq_mse(pi_p, pi_t, in_len)

    mel_l1 = jnp.mean(jnp.sum(jnp.abs(mel_p - mel_t), axis=(1, 2)) / (C * out_len))
    mel_l2 = jnp.mean(jnp.sum((mel_p - mel_t) ** 2, axis=(1, 2)) / (C * out_len))

    w_iter = (iteration * hp["warmup_steps"] ** (-1.5)
              * hp["adv_max_weight"] / hp["warmup_steps"] ** (-0.5))
    speaker_w = min(hp["adv_max_weight"], w_iter)

    speaker_loss = speaker_w * speaker_loss
    post_mult_loss = hp["post_mult_weight"] * post_mult_loss
    duration_loss = hp["dur_weight"] * duration_loss
    energy_loss = hp["energy_weight"] * energy_loss
    pitch_loss = hp["pitch_weight"] * pitch_loss
    mel_l1 = hp["mel_spec_weight"] * mel_l1
    mel_l2 = hp["mel_spec_weight"] * mel_l2
    emotion_classifier_loss = hp["emotion_classifier_loss"] * emotion_loss

    total = (speaker_loss + post_mult_loss + duration_loss + energy_loss
             + pitch_loss + mel_l1 + mel_l2 + emotion_classifier_loss)
    return total


# ---------------------------------------------------------------------------
def _make_case(key, hparams, B, L, C, T, n_speakers=16, n_emotions=8):
    ks = jax.random.split(key, 12)
    dur_p = jax.random.normal(ks[0], (B, L), jnp.float32)
    dur_t = jax.random.normal(ks[1], (B, L), jnp.float32)
    en_p = jax.random.normal(ks[2], (B, L), jnp.float32)
    en_t = jax.random.normal(ks[3], (B, L), jnp.float32)
    pi_p = jax.random.normal(ks[4], (B, L), jnp.float32)
    pi_t = jax.random.normal(ks[5], (B, L), jnp.float32)
    mel_p = jax.random.normal(ks[6], (B, C, T), jnp.float32)
    mel_t = jax.random.normal(ks[7], (B, C, T), jnp.float32)
    spk_logits = jax.random.normal(ks[8], (B, n_speakers), jnp.float32)
    emo_logits = jax.random.normal(ks[9], (B, n_emotions), jnp.float32)
    post_mult = 0.1 * jax.random.normal(ks[10], (4, 32), jnp.float32)
    prosody_embeds = jax.random.normal(ks[11], (B, 32), jnp.float32)

    spk_ids = jnp.arange(B, dtype=jnp.int32) % n_speakers
    mapped_emotions = (jnp.arange(B, dtype=jnp.int32) + 1) % n_emotions
    input_lengths = jnp.linspace(float(L), max(1.0, float(L) - 2.0), B).astype(jnp.float32)
    output_lengths = jnp.linspace(float(T), max(1.0, float(T) * 0.75), B).astype(jnp.float32)

    targets = (dur_t, en_t, pi_t, mel_t, spk_ids, None, mapped_emotions)
    outputs = (
        spk_logits,
        post_mult,                                  # film post_multipliers
        (dur_p, en_p, pi_p, input_lengths),         # encoder_preds
        (mel_p, output_lengths),                    # decoder_preds
        prosody_embeds,
        emo_logits,
    )
    return outputs, targets


if __name__ == "__main__":
    base_hp = {
        "n_mel_channels": 4,
        "warmup_steps": 4000,
        "adv_max_weight": 1e-2,
        "post_mult_weight": 1e-3,
        "dur_weight": 1.0,
        "energy_weight": 1.0,
        "pitch_weight": 1.0,
        "mel_spec_weight": 1.0,
        "contr_weight": 0.0,
        "emotion_classifier_loss": 1.0,
        "use_emotion_classifier": True,
    }
    iteration = 100
    key = jax.random.PRNGKey(0)
    k1, k2 = jax.random.split(key)

    # Case 1: tiny aligned-ish case, single mel tile (spatial=16, batch=2, channels=4)
    hp1 = dict(base_hp, n_mel_channels=4)
    outputs1, targets1 = _make_case(k1, hp1, B=2, L=8, C=4, T=16)
    loss1, _ = DaftExprtLoss(hp1)(outputs1, targets1, iteration)
    loss1 = jax.block_until_ready(loss1)
    ref1 = _reference_loss(outputs1, targets1, iteration, hp1)
    np.testing.assert_allclose(np.asarray(loss1), np.asarray(ref1),
                               rtol=1e-5, atol=1e-6)

    # Case 2: ragged case exercising both row & column edge-masking paths, 2-core
    # split and a forced 128-lane mel tile (multi-step reduction axis).
    hp2 = dict(base_hp, n_mel_channels=12, post_mult_weight=0.0,
               use_emotion_classifier=False)
    outputs2, targets2 = _make_case(k2, hp2, B=2, L=8, C=12, T=200)
    loss2, _ = DaftExprtLoss(hp2, mel_tile_override=128)(outputs2, targets2, iteration)
    loss2 = jax.block_until_ready(loss2)
    ref2 = _reference_loss(outputs2, targets2, iteration, hp2)
    np.testing.assert_allclose(np.asarray(loss2), np.asarray(ref2),
                               rtol=1e-5, atol=1e-6)

    print("KERNEL_OK")
</pallas_src>

<mosaic_0001>
module attributes {stable_mosaic.version = 11 : i64} {
  func.func @kernel(%arg0: i32, %arg1: i32, %arg2: memref<6x8xf32, #tpu.memory_space<vmem>>, %arg3: memref<6x8xf32, #tpu.memory_space<vmem>>, %arg4: memref<6x1xf32, #tpu.memory_space<vmem>>, %arg5: memref<2x16xf32, #tpu.memory_space<vmem>>, %arg6: memref<2x1xi32, #tpu.memory_space<vmem>>, %arg7: memref<2x8xf32, #tpu.memory_space<vmem>>, %arg8: memref<2x1xi32, #tpu.memory_space<vmem>>, %arg9: memref<4x32xf32, #tpu.memory_space<vmem>>, %arg10: memref<8x16xf32, #tpu.memory_space<vmem>>, %arg11: memref<8x16xf32, #tpu.memory_space<vmem>>, %arg12: memref<8x1xf32, #tpu.memory_space<vmem>>, %arg13: memref<1x9xf32, #tpu.memory_space<smem>>, %arg14: memref<8x1xf32, #tpu.memory_space<vmem>>, %arg15: memref<8x1xf32, #tpu.memory_space<vmem>>) attributes {dimension_semantics = [#tpu.dimension_semantics<parallel>, #tpu.dimension_semantics<arbitrary>], iteration_bounds = array<i64: 1, 1>, scalar_prefetch = 0 : i64, scratch_operands = 2 : i64, tpu.core_type = #tpu.core_type<tc>, window_params = [{pipeline_mode = #tpu.pipeline_mode<synchronous>, transform_indices = @transform_0, window_bounds = array<i64: 6, 8>}, {pipeline_mode = #tpu.pipeline_mode<synchronous>, transform_indices = @transform_1, window_bounds = array<i64: 6, 8>}, {pipeline_mode = #tpu.pipeline_mode<synchronous>, transform_indices = @transform_2, window_bounds = array<i64: 6, 1>}, {pipeline_mode = #tpu.pipeline_mode<synchronous>, transform_indices = @transform_3, window_bounds = array<i64: 2, 16>}, {pipeline_mode = #tpu.pipeline_mode<synchronous>, transform_indices = @transform_4, window_bounds = array<i64: 2, 1>}, {pipeline_mode = #tpu.pipeline_mode<synchronous>, transform_indices = @transform_5, window_bounds = array<i64: 2, 8>}, {pipeline_mode = #tpu.pipeline_mode<synchronous>, transform_indices = @transform_6, window_bounds = array<i64: 2, 1>}, {pipeline_mode = #tpu.pipeline_mode<synchronous>, transform_indices = @transform_7, window_bounds = array<i64: 4, 32>}, {transform_indices = @transform_8, window_bounds = array<i64: 8, 16>}, {transform_indices = @transform_9, window_bounds = array<i64: 8, 16>}, {transform_indices = @transform_10, window_bounds = array<i64: 8, 1>}, {transform_indices = @transform_11, window_bounds = array<i64: 1, 9>}]} {
    %c0_i32 = arith.constant 0 : i32
    %0 = arith.cmpi eq, %arg1, %c0_i32 : i32
    %1 = arith.extui %0 : i1 to i32
    %c0_i32_0 = arith.constant 0 : i32
    %2 = arith.cmpi ne, %1, %c0_i32_0 : i32
    scf.if %2 {
      %cst_15 = arith.constant 0.000000e+00 : f32
      %21 = vector.broadcast %cst_15 : f32 to vector<8x1xf32>
      %c0_16 = arith.constant 0 : index
      %c0_17 = arith.constant 0 : index
      %22 = vector.load %arg14[%c0_16, %c0_17] : memref<8x1xf32, #tpu.memory_space<vmem>>, vector<8x1xf32>
      tpu.vector_store %arg14[%c0_16, %c0_17], %21 {strides = array<i32>} : memref<8x1xf32, #tpu.memory_space<vmem>>, vector<8x1xf32>,
      %cst_18 = arith.constant 0.000000e+00 : f32
      %23 = vector.broadcast %cst_18 : f32 to vector<8x1xf32>
      %c0_19 = arith.constant 0 : index
      %c0_20 = arith.constant 0 : index
      %24 = vector.load %arg15[%c0_19, %c0_20] : memref<8x1xf32, #tpu.memory_space<vmem>>, vector<8x1xf32>
      tpu.vector_store %arg15[%c0_19, %c0_20], %23 {strides = array<i32>} : memref<8x1xf32, #tpu.memory_space<vmem>>, vector<8x1xf32>,
    } else {
    }
    %c0 = arith.constant 0 : index
    %c0_1 = arith.constant 0 : index
    %3 = vector.load %arg10[%c0, %c0_1] : memref<8x16xf32, #tpu.memory_space<vmem>>, vector<8x16xf32>
    %c0_2 = arith.constant 0 : index
    %c0_3 = arith.constant 0 : index
    %4 = vector.load %arg11[%c0_2, %c0_3] : memref<8x16xf32, #tpu.memory_space<vmem>>, vector<8x16xf32>
    %5 = arith.subf %3, %4 : vector<8x16xf32>
    %c0_4 = arith.constant 0 : index
    %c0_5 = arith.constant 0 : index
    %6 = vector.load %arg14[%c0_4, %c0_5] : memref<8x1xf32, #tpu.memory_space<vmem>>, vector<8x1xf32>
    %7 = math.absf %5 : vector<8x16xf32>
    %cst = arith.constant dense<0.000000e+00> : vector<8xf32>
    %8 = vector.multi_reduction <add>, %7, %cst [1] : vector<8x16xf32> to vector<8xf32>
    %9 = vector.shape_cast %8 : vector<8xf32> to vector<8x1xf32>
    %10 = arith.addf %6, %9 : vector<8x1xf32>
    %c0_6 = arith.constant 0 : index
    %c0_7 = arith.constant 0 : index
    %11 = vector.load %arg14[%c0_6, %c0_7] : memref<8x1xf32, #tpu.memory_space<vmem>>, vector<8x1xf32>
    tpu.vector_store %arg14[%c0_6, %c0_7], %10 {strides = array<i32>} : memref<8x1xf32, #tpu.memory_space<vmem>>, vector<8x1xf32>,
    %c0_8 = arith.constant 0 : index
    %c0_9 = arith.constant 0 : index
    %12 = vector.load %arg15[%c0_8, %c0_9] : memref<8x1xf32, #tpu.memory_space<vmem>>, vector<8x1xf32>
    %13 = arith.mulf %5, %5 : vector<8x16xf32>
    %cst_10 = arith.constant dense<0.000000e+00> : vector<8xf32>
    %14 = vector.multi_reduction <add>, %13, %cst_10 [1] : vector<8x16xf32> to vector<8xf32>
    %15 = vector.shape_cast %14 : vector<8xf32> to vector<8x1xf32>
    %16 = arith.addf %12, %15 : vector<8x1xf32>
    %c0_11 = arith.constant 0 : index
    %c0_12 = arith.constant 0 : index
    %17 = vector.load %arg15[%c0_11, %c0_12] : memref<8x1xf32, #tpu.memory_space<vmem>>, vector<8x1xf32>
    tpu.vector_store %arg15[%c0_11, %c0_12], %16 {strides = array<i32>} : memref<8x1xf32, #tpu.memory_space<vmem>>, vector<8x1xf32>,
    %c0_i32_13 = arith.constant 0 : i32
    %18 = arith.cmpi eq, %arg1, %c0_i32_13 : i32
    %19 = arith.extui %18 : i1 to i32
    %c0_i32_14 = arith.constant 0 : i32
    %20 = arith.cmpi ne, %19, %c0_i32_14 : i32
    scf.if %20 {
      %c0_i32_15 = arith.constant 0 : i32
      %21 = arith.cmpi eq, %arg0, %c0_i32_15 : i32
      %22 = arith.extui %21 : i1 to i32
      %23 = arith.sitofp %22 : i32 to f32
      %c0_16 = arith.constant 0 : index
      %c0_17 = arith.constant 0 : index
      %24 = vector.load %arg2[%c0_16, %c0_17] : memref<6x8xf32, #tpu.memory_space<vmem>>, vector<6x8xf32>
      %c0_18 = arith.constant 0 : index
      %c0_19 = arith.constant 0 : index
      %25 = vector.load %arg3[%c0_18, %c0_19] : memref<6x8xf32, #tpu.memory_space<vmem>>, vector<6x8xf32>
      %26 = arith.subf %24, %25 : vector<6x8xf32>
      %27 = arith.mulf %26, %26 : vector<6x8xf32>
      %cst_20 = arith.constant dense<0.000000e+00> : vector<6xf32>
      %28 = vector.multi_reduction <add>, %27, %cst_20 [1] : vector<6x8xf32> to vector<6xf32>
      %29 = vector.shape_cast %28 : vector<6xf32> to vector<6x1xf32>
      %c0_21 = arith.constant 0 : index
      %c0_22 = arith.constant 0 : index
      %30 = vector.load %arg4[%c0_21, %c0_22] : memref<6x1xf32, #tpu.memory_space<vmem>>, vector<6x1xf32>
      %31 = arith.mulf %29, %30 : vector<6x1xf32>
      %32 = tpu.iota {dimensions = array<i32: 0>} : vector<6x1xi32>
      %c2_i32 = arith.constant 2 : i32
      %33 = vector.broadcast %c2_i32 : i32 to vector<6x1xi32>
      %34 = arith.cmpi slt, %32, %33 : vector<6x1xi32>
      %cst_23 = arith.constant 0.000000e+00 : f32
      %35 = vector.broadcast %cst_23 : f32 to vector<6x1xf32>
      %36 = arith.select %34, %31, %35 : vector<6x1xi1>, vector<6x1xf32>
      %37 = vector.shape_cast %36 : vector<6x1xf32> to vector<1x6x1xf32>
      %cst_24 = arith.constant dense<0.000000e+00> : vector<1xf32>
      %38 = vector.multi_reduction <add>, %37, %cst_24 [1, 2] : vector<1x6x1xf32> to vector<1xf32>
      %39 = vector.shape_cast %38 : vector<1xf32> to vector<1x1x1xf32>
      %40 = vector.extract %39[0, 0, 0] : f32 from vector<1x1x1xf32>
      %cst_25 = arith.constant 1.000000e+00 : f32
      %41 = arith.mulf %cst_25, %40 : f32
      %42 = arith.mulf %41, %23 : f32
      %c2_i32_26 = arith.constant 2 : i32
      %43 = vector.broadcast %c2_i32_26 : i32 to vector<6x1xi32>
      %44 = arith.cmpi sge, %32, %43 : vector<6x1xi32>
      %c4_i32 = arith.constant 4 : i32
      %45 = vector.broadcast %c4_i32 : i32 to vector<6x1xi32>
      %46 = arith.cmpi slt, %32, %45 : vector<6x1xi32>
      %47 = arith.andi %44, %46 : vector<6x1xi1>
      %cst_27 = arith.constant 0.000000e+00 : f32
      %48 = vector.broadcast %cst_27 : f32 to vector<6x1xf32>
      %49 = arith.select %47, %31, %48 : vector<6x1xi1>, vector<6x1xf32>
      %50 = vector.shape_cast %49 : vector<6x1xf32> to vector<1x6x1xf32>
      %cst_28 = arith.constant dense<0.000000e+00> : vector<1xf32>
      %51 = vector.multi_reduction <add>, %50, %cst_28 [1, 2] : vector<1x6x1xf32> to vector<1xf32>
      %52 = vector.shape_cast %51 : vector<1xf32> to vector<1x1x1xf32>
      %53 = vector.extract %52[0, 0, 0] : f32 from vector<1x1x1xf32>
      %cst_29 = arith.constant 1.000000e+00 : f32
      %54 = arith.mulf %cst_29, %53 : f32
      %55 = arith.mulf %54, %23 : f32
      %c4_i32_30 = arith.constant 4 : i32
      %56 = vector.broadcast %c4_i32_30 : i32 to vector<6x1xi32>
      %57 = arith.cmpi sge, %32, %56 : vector<6x1xi32>
      %cst_31 = arith.constant 0.000000e+00 : f32
      %58 = vector.broadcast %cst_31 : f32 to vector<6x1xf32>
      %59 = arith.select %57, %31, %58 : vector<6x1xi1>, vector<6x1xf32>
      %60 = vector.shape_cast %59 : vector<6x1xf32> to vector<1x6x1xf32>
      %cst_32 = arith.constant dense<0.000000e+00> : vector<1xf32>
      %61 = vector.multi_reduction <add>, %60, %cst_32 [1, 2] : vector<1x6x1xf32> to vector<1xf32>
      %62 = vector.shape_cast %61 : vector<1xf32> to vector<1x1x1xf32>
      %63 = vector.extract %62[0, 0, 0] : f32 from vector<1x1x1xf32>
      %cst_33 = arith.constant 1.000000e+00 : f32
      %64 = arith.mulf %cst_33, %63 : f32
      %65 = arith.mulf %64, %23 : f32
      %c0_34 = arith.constant 0 : index
      %c0_35 = arith.constant 0 : index
      %66 = vector.load %arg5[%c0_34, %c0_35] : memref<2x16xf32, #tpu.memory_space<vmem>>, vector<2x16xf32>
      %cst_36 = arith.constant dense<0xFF800000> : vector<2xf32>
      %67 = vector.multi_reduction <maximumf>, %66, %cst_36 [1] : vector<2x16xf32> to vector<2xf32>
      %68 = vector.shape_cast %67 : vector<2xf32> to vector<2x1xf32>
      %69 = vector.broadcast %68 : vector<2x1xf32> to vector<2x16xf32>
      %70 = arith.subf %66, %69 : vector<2x16xf32>
      %71 = math.exp %70 : vector<2x16xf32>
      %cst_37 = arith.constant dense<0.000000e+00> : vector<2xf32>
      %72 = vector.multi_reduction <add>, %71, %cst_37 [1] : vector<2x16xf32> to vector<2xf32>
      %73 = vector.shape_cast %72 : vector<2xf32> to vector<2x1xf32>
      %74 = math.log %73 : vector<2x1xf32>
      %75 = arith.addf %74, %68 : vector<2x1xf32>
      %76 = tpu.iota {dimensions = array<i32: 1>} : vector<2x16xi32>
      %c0_38 = arith.constant 0 : index
      %c0_39 = arith.constant 0 : index
      %77 = vector.load %arg6[%c0_38, %c0_39] : memref<2x1xi32, #tpu.memory_space<vmem>>, vector<2x1xi32>
      %78 = vector.broadcast %77 : vector<2x1xi32> to vector<2x16xi32>
      %79 = arith.cmpi eq, %76, %78 : vector<2x16xi32>
      %80 = arith.extui %79 : vector<2x16xi1> to vector<2x16xi32>
      %81 = arith.sitofp %80 : vector<2x16xi32> to vector<2x16xf32>
      %82 = arith.mulf %81, %66 : vector<2x16xf32>
      %cst_40 = arith.constant dense<0.000000e+00> : vector<2xf32>
      %83 = vector.multi_reduction <add>, %82, %cst_40 [1] : vector<2x16xf32> to vector<2xf32>
      %84 = vector.shape_cast %83 : vector<2xf32> to vector<2x1xf32>
      %85 = arith.subf %75, %84 : vector<2x1xf32>
      %86 = vector.shape_cast %85 : vector<2x1xf32> to vector<1x2x1xf32>
      %cst_41 = arith.constant dense<0.000000e+00> : vector<1xf32>
      %87 = vector.multi_reduction <add>, %86, %cst_41 [1, 2] : vector<1x2x1xf32> to vector<1xf32>
      %88 = vector.shape_cast %87 : vector<1xf32> to vector<1x1x1xf32>
      %89 = vector.extract %88[0, 0, 0] : f32 from vector<1x1x1xf32>
      %cst_42 = arith.constant 5.000000e-01 : f32
      %90 = arith.mulf %89, %cst_42 : f32
      %cst_43 = arith.constant 2.500000e-04 : f32
      %91 = arith.mulf %cst_43, %90 : f32
      %92 = arith.mulf %91, %23 : f32
      %c0_44 = arith.constant 0 : index
      %c0_45 = arith.constant 0 : index
      %93 = vector.load %arg7[%c0_44, %c0_45] : memref<2x8xf32, #tpu.memory_space<vmem>>, vector<2x8xf32>
      %cst_46 = arith.constant dense<0xFF800000> : vector<2xf32>
      %94 = vector.multi_reduction <maximumf>, %93, %cst_46 [1] : vector<2x8xf32> to vector<2xf32>
      %95 = vector.shape_cast %94 : vector<2xf32> to vector<2x1xf32>
      %96 = vector.broadcast %95 : vector<2x1xf32> to vector<2x8xf32>
      %97 = arith.subf %93, %96 : vector<2x8xf32>
      %98 = math.exp %97 : vector<2x8xf32>
      %cst_47 = arith.constant dense<0.000000e+00> : vector<2xf32>
      %99 = vector.multi_reduction <add>, %98, %cst_47 [1] : vector<2x8xf32> to vector<2xf32>
      %100 = vector.shape_cast %99 : vector<2xf32> to vector<2x1xf32>
      %101 = math.log %100 : vector<2x1xf32>
      %102 = arith.addf %101, %95 : vector<2x1xf32>
      %103 = tpu.iota {dimensions = array<i32: 1>} : vector<2x8xi32>
      %c0_48 = arith.constant 0 : index
      %c0_49 = arith.constant 0 : index
      %104 = vector.load %arg8[%c0_48, %c0_49] : memref<2x1xi32, #tpu.memory_space<vmem>>, vector<2x1xi32>
      %105 = vector.broadcast %104 : vector<2x1xi32> to vector<2x8xi32>
      %106 = arith.cmpi eq, %103, %105 : vector<2x8xi32>
      %107 = arith.extui %106 : vector<2x8xi1> to vector<2x8xi32>
      %108 = arith.sitofp %107 : vector<2x8xi32> to vector<2x8xf32>
      %109 = arith.mulf %108, %93 : vector<2x8xf32>
      %cst_50 = arith.constant dense<0.000000e+00> : vector<2xf32>
      %110 = vector.multi_reduction <add>, %109, %cst_50 [1] : vector<2x8xf32> to vector<2xf32>
      %111 = vector.shape_cast %110 : vector<2xf32> to vector<2x1xf32>
      %112 = arith.subf %102, %111 : vector<2x1xf32>
      %113 = vector.shape_cast %112 : vector<2x1xf32> to vector<1x2x1xf32>
      %cst_51 = arith.constant dense<0.000000e+00> : vector<1xf32>
      %114 = vector.multi_reduction <add>, %113, %cst_51 [1, 2] : vector<1x2x1xf32> to vector<1xf32>
      %115 = vector.shape_cast %114 : vector<1xf32> to vector<1x1x1xf32>
      %116 = vector.extract %115[0, 0, 0] : f32 from vector<1x1x1xf32>
      %cst_52 = arith.constant 5.000000e-01 : f32
      %117 = arith.mulf %116, %cst_52 : f32
      %cst_53 = arith.constant 1.000000e+00 : f32
      %118 = arith.mulf %cst_53, %117 : f32
      %119 = arith.mulf %118, %23 : f32
      %c0_54 = arith.constant 0 : index
      %c0_55 = arith.constant 0 : index
      %120 = vector.load %arg9[%c0_54, %c0_55] : memref<4x32xf32, #tpu.memory_space<vmem>>, vector<4x32xf32>
      %121 = arith.mulf %120, %120 : vector<4x32xf32>
      %122 = vector.shape_cast %121 : vector<4x32xf32> to vector<1x4x32xf32>
      %cst_56 = arith.constant dense<0.000000e+00> : vector<1xf32>
      %123 = vector.multi_reduction <add>, %122, %cst_56 [1, 2] : vector<1x4x32xf32> to vector<1xf32>
      %124 = vector.shape_cast %123 : vector<1xf32> to vector<1x1x1xf32>
      %125 = vector.extract %124[0, 0, 0] : f32 from vector<1x1x1xf32>
      %126 = math.sqrt %125 : f32
      %cst_57 = arith.constant 1.000000e-03 : f32
      %127 = arith.mulf %cst_57, %126 : f32
      %128 = arith.mulf %127, %23 : f32
      %c0_58 = arith.constant 0 : index
      %c0_59 = arith.constant 0 : index
      %129 = vector.load %arg12[%c0_58, %c0_59] : memref<8x1xf32, #tpu.memory_space<vmem>>, vector<8x1xf32>
      %c0_60 = arith.constant 0 : index
      %c0_61 = arith.constant 0 : index
      %130 = vector.load %arg14[%c0_60, %c0_61] : memref<8x1xf32, #tpu.memory_space<vmem>>, vector<8x1xf32>
      %131 = arith.mulf %130, %129 : vector<8x1xf32>
      %132 = vector.shape_cast %131 : vector<8x1xf32> to vector<1x8x1xf32>
      %cst_62 = arith.constant dense<0.000000e+00> : vector<1xf32>
      %133 = vector.multi_reduction <add>, %132, %cst_62 [1, 2] : vector<1x8x1xf32> to vector<1xf32>
      %134 = vector.shape_cast %133 : vector<1xf32> to vector<1x1x1xf32>
      %135 = vector.extract %134[0, 0, 0] : f32 from vector<1x1x1xf32>
      %cst_63 = arith.constant 1.000000e+00 : f32
      %136 = arith.mulf %cst_63, %135 : f32
      %c0_64 = arith.constant 0 : index
      %c0_65 = arith.constant 0 : index
      %137 = vector.load %arg15[%c0_64, %c0_65] : memref<8x1xf32, #tpu.memory_space<vmem>>, vector<8x1xf32>
      %138 = arith.mulf %137, %129 : vector<8x1xf32>
      %139 = vector.shape_cast %138 : vector<8x1xf32> to vector<1x8x1xf32>
      %cst_66 = arith.constant dense<0.000000e+00> : vector<1xf32>
      %140 = vector.multi_reduction <add>, %139, %cst_66 [1, 2] : vector<1x8x1xf32> to vector<1xf32>
      %141 = vector.shape_cast %140 : vector<1xf32> to vector<1x1x1xf32>
      %142 = vector.extract %141[0, 0, 0] : f32 from vector<1x1x1xf32>
      %cst_67 = arith.constant 1.000000e+00 : f32
      %143 = arith.mulf %cst_67, %142 : f32
      %144 = arith.addf %92, %128 : f32
      %145 = arith.addf %144, %42 : f32
      %146 = arith.addf %145, %55 : f32
      %147 = arith.addf %146, %65 : f32
      %148 = arith.addf %147, %136 : f32
      %149 = arith.addf %148, %143 : f32
      %150 = arith.addf %149, %119 : f32
      %c0_68 = arith.constant 0 : index
      %c0_69 = arith.constant 0 : index
      %151 = memref.load %arg13[%c0_68, %c0_69] : memref<1x9xf32, #tpu.memory_space<smem>>
      memref.store %92, %arg13[%c0_68, %c0_69] : memref<1x9xf32, #tpu.memory_space<smem>>
      %c0_70 = arith.constant 0 : index
      %c1 = arith.constant 1 : index
      %152 = memref.load %arg13[%c0_70, %c1] : memref<1x9xf32, #tpu.memory_space<smem>>
      memref.store %128, %arg13[%c0_70, %c1] : memref<1x9xf32, #tpu.memory_space<smem>>
      %c0_71 = arith.constant 0 : index
      %c2 = arith.constant 2 : index
      %153 = memref.load %arg13[%c0_71, %c2] : memref<1x9xf32, #tpu.memory_space<smem>>
      memref.store %42, %arg13[%c0_71, %c2] : memref<1x9xf32, #tpu.memory_space<smem>>
      %c0_72 = arith.constant 0 : index
      %c3 = arith.constant 3 : index
      %154 = memref.load %arg13[%c0_72, %c3] : memref<1x9xf32, #tpu.memory_space<smem>>
      memref.store %55, %arg13[%c0_72, %c3] : memref<1x9xf32, #tpu.memory_space<smem>>
      %c0_73 = arith.constant 0 : index
      %c4 = arith.constant 4 : index
      %155 = memref.load %arg13[%c0_73, %c4] : memref<1x9xf32, #tpu.memory_space<smem>>
      memref.store %65, %arg13[%c0_73, %c4] : memref<1x9xf32, #tpu.memory_space<smem>>
      %c0_74 = arith.constant 0 : index
      %c5 = arith.constant 5 : index
      %156 = memref.load %arg13[%c0_74, %c5] : memref<1x9xf32, #tpu.memory_space<smem>>
      memref.store %136, %arg13[%c0_74, %c5] : memref<1x9xf32, #tpu.memory_space<smem>>
      %c0_75 = arith.constant 0 : index
      %c6 = arith.constant 6 : index
      %157 = memref.load %arg13[%c0_75, %c6] : memref<1x9xf32, #tpu.memory_space<smem>>
      memref.store %143, %arg13[%c0_75, %c6] : memref<1x9xf32, #tpu.memory_space<smem>>
      %c0_76 = arith.constant 0 : index
      %c7 = arith.constant 7 : index
      %158 = memref.load %arg13[%c0_76, %c7] : memref<1x9xf32, #tpu.memory_space<smem>>
      memref.store %119, %arg13[%c0_76, %c7] : memref<1x9xf32, #tpu.memory_space<smem>>
      %c0_77 = arith.constant 0 : index
      %c8 = arith.constant 8 : index
      %159 = memref.load %arg13[%c0_77, %c8] : memref<1x9xf32, #tpu.memory_space<smem>>
      memref.store %150, %arg13[%c0_77, %c8] : memref<1x9xf32, #tpu.memory_space<smem>>
    } else {
    }
    return
  }
  func.func @transform_0(%arg0: i32, %arg1: i32) -> (i32, i32) {
    %c0_i32 = arith.constant 0 : i32
    %c0_i32_0 = arith.constant 0 : i32
    %c0_i32_1 = arith.constant 0 : i32
    return %c0_i32, %c0_i32_0 : i32, i32
  }
  func.func @transform_1(%arg0: i32, %arg1: i32) -> (i32, i32) {
    %c0_i32 = arith.constant 0 : i32
    %c0_i32_0 = arith.constant 0 : i32
    %c0_i32_1 = arith.constant 0 : i32
    return %c0_i32, %c0_i32_0 : i32, i32
  }
  func.func @transform_2(%arg0: i32, %arg1: i32) -> (i32, i32) {
    %c0_i32 = arith.constant 0 : i32
    %c0_i32_0 = arith.constant 0 : i32
    %c0_i32_1 = arith.constant 0 : i32
    return %c0_i32, %c0_i32_0 : i32, i32
  }
  func.func @transform_3(%arg0: i32, %arg1: i32) -> (i32, i32) {
    %c0_i32 = arith.constant 0 : i32
    %c0_i32_0 = arith.constant 0 : i32
    %c0_i32_1 = arith.constant 0 : i32
    return %c0_i32, %c0_i32_0 : i32, i32
  }
  func.func @transform_4(%arg0: i32, %arg1: i32) -> (i32, i32) {
    %c0_i32 = arith.constant 0 : i32
    %c0_i32_0 = arith.constant 0 : i32
    %c0_i32_1 = arith.constant 0 : i32
    return %c0_i32, %c0_i32_0 : i32, i32
  }
  func.func @transform_5(%arg0: i32, %arg1: i32) -> (i32, i32) {
    %c0_i32 = arith.constant 0 : i32
    %c0_i32_0 = arith.constant 0 : i32
    %c0_i32_1 = arith.constant 0 : i32
    return %c0_i32, %c0_i32_0 : i32, i32
  }
  func.func @transform_6(%arg0: i32, %arg1: i32) -> (i32, i32) {
    %c0_i32 = arith.constant 0 : i32
    %c0_i32_0 = arith.constant 0 : i32
    %c0_i32_1 = arith.constant 0 : i32
    return %c0_i32, %c0_i32_0 : i32, i32
  }
  func.func @transform_7(%arg0: i32, %arg1: i32) -> (i32, i32) {
    %c0_i32 = arith.constant 0 : i32
    %c0_i32_0 = arith.constant 0 : i32
    %c0_i32_1 = arith.constant 0 : i32
    return %c0_i32, %c0_i32_0 : i32, i32
  }
  func.func @transform_8(%arg0: i32, %arg1: i32) -> (i32, i32) {
    %c0_i32 = arith.constant 0 : i32
    return %arg0, %arg1 : i32, i32
  }
  func.func @transform_9(%arg0: i32, %arg1: i32) -> (i32, i32) {
    %c0_i32 = arith.constant 0 : i32
    return %arg0, %arg1 : i32, i32
  }
  func.func @transform_10(%arg0: i32, %arg1: i32) -> (i32, i32) {
    %c0_i32 = arith.constant 0 : i32
    %c0_i32_0 = arith.constant 0 : i32
    return %arg0, %c0_i32 : i32, i32
  }
  func.func @transform_11(%arg0: i32, %arg1: i32) -> (i32, i32) {
    %c0_i32 = arith.constant 0 : i32
    %c0_i32_0 = arith.constant 0 : i32
    return %arg0, %c0_i32 : i32, i32
  }
}

</mosaic_0001>

<bundles_post_ra>
// kernel: tpu_custom_call.1
= control target key start
LH: loop header
LB: loop body
LE: loop exit
PB: predicated region body
PF: predicated region fallthrough
CT: control target
= control target key end

     0   :  { %16 = vsyncpa [#allocation5], 0  ;;  %s609_s0 = inlined_call_operand.vmem [shape: f32[6,8], index: 0, kind: input, shape index: {}]   ;;  %s610_s1 = inlined_call_operand.vmem [shape: f32[6,8], index: 1, kind: input, shape index: {}]   ;;  %s611_s2 = inlined_call_operand.vmem [shape: f32[6,1], index: 2, kind: input, shape index: {}]   ;;  %s612_s3 = inlined_call_operand.hbm [shape: f32[2,16], index: 3, kind: input, shape index: {}]   ;;  %s613_s4 = inlined_call_operand.vmem [shape: s32[2,1], index: 4, kind: input, shape index: {}]   ;;  %s614_s5 = inlined_call_operand.hbm [shape: f32[2,8], index: 5, kind: input, shape index: {}]   ;;  %s615_s6 = inlined_call_operand.vmem [shape: s32[2,1], index: 6, kind: input, shape index: {}]   ;;  %s616_s7 = inlined_call_operand.hbm [shape: f32[4,32], index: 7, kind: input, shape index: {}]   ;;  %s617_s8 = inlined_call_operand.vmem [shape: f32[8,16], index: 8, kind: input, shape index: {}]   ;;  %s618_s9 = inlined_call_operand.vmem [shape: f32[8,16], index: 9, kind: input, shape index: {}]   ;;  %s619_s10 = inlined_call_operand.vmem [shape: f32[8,1], index: 10, kind: input, shape index: {}]   ;;  %s620_s11 = inlined_call_operand.hbm [shape: f32[1,9], index: 11, kind: output, shape index: {}]  }
   0x1   :  { %17 = vsyncpa [#allocation8], 0  ;;  %s43_s19 = sshll.u32 %s614_s5, 4  ;;  %s44_s19 = int_to_ptr.hbm [resolvable:$true] %s43_s19 }
   0x2   :  { %18 = vsyncpa [#allocation6], 0  ;;  %s470_s20 = smov [#allocation7]   ;;  %s30_s24 = sshll.u32 %s612_s3, 4  ;;  %s31_s24 = int_to_ptr.hbm [resolvable:$true] %s30_s24 }
   0x3   :  { %s45_s21 = sshll.u32 %s470_s20, 4  ;;  %s471_s25 = smov [#allocation4]   ;;  %s46_s21 = int_to_ptr.vmem [resolvable:$true] %s45_s21 }
   0x4   :  { %48 = dma.hbm_to_vmem [thread:$0]  %s44_s19, 32, %s46_s21, [#allocation8]  }
   0x5   :  { %s32_s26 = sshll.u32 %s471_s25, 4  ;;  %s56_s29 = sshll.u32 %s616_s7, 4  ;;  %s33_s26 = int_to_ptr.vmem [resolvable:$true] %s32_s26  ;;  %s57_s29 = int_to_ptr.hbm [resolvable:$true] %s56_s29 }
   0x6   :  { %35 = dma.hbm_to_vmem [thread:$0]  %s31_s24, 32, %s33_s26, [#allocation5]  }
   0x7   :  { %s472_s5 = smov [#allocation9]  }
   0x8   :  { %s58_s30 = sshll.u32 %s472_s5, 4  ;;  %s59_s30 = int_to_ptr.vmem [resolvable:$true] %s58_s30 }
   0x9   :  { %61 = dma.hbm_to_vmem [thread:$0]  %s57_s29, 64, %s59_s30, [#allocation8]  }
   0xa   :  { %464 = dma.done.wait [#allocation5], 32  }
   0xb   :  { %465 = vsyncadd [#allocation5], 4294967264 }
   0xc   :  { %466 = dma.done.wait [#allocation8], 96  }
   0xd   :  { %467 = vsyncadd [#allocation8], 4294967200  ;;  %v473_v0 = vmov 0   ;;  %vm167_vm0 = vcmask 123904   ;;  %v166_v1 = vld [vmem:[#allocation4] sm:$0x3]  ;;  %v122_v13 = vlaneseq }
   0xe   :  { %368 = vset.pattern.permute.xlu1 %v473_v0  ;;  %369 = vset.pattern.permute.xlu0 %v473_v0  ;;  %v182_v2 = vld [vmem:[%s613_s4] sm:$0x3]  ;;  %v168_v3 = vsel %vm167_vm0, %v166_v1, -inf  ;;  %v208_v4 = vld [vmem:[#allocation7] sm:$0x3]  ;;  %vm209_vm1 = vcmask 58368  }
   0xf   :  { %184 = vperm.xlu1 %368, %v182_v2   ;;  %169 = vmax.xlane.f32.xlu0 %v168_v3  ;;  %v222_v5 = vld [vmem:[%s615_s6] sm:$0x3]  ;;  %v210_v6 = vsel %vm209_vm1, %v208_v4, -inf  ;;  %vm116_vm2 = vcmask 62464   ;;  %vm84_vm3 = vcmask 7168   ;;  %v474_v12 = vmov 0.0  }
  0x10   :  { %v112_v7 = vld [vmem:[%s609_s0] sm:$0x3f]  ;;  %85 = vst.msk [vmem:[#allocation2] sm:$0xff] %vm84_vm3, %v474_v12  ;;  %v181_v14 = vand.u32 127, %v122_v13  ;;  %v123_v33 = vshrl.u32 %v122_v13, 7  ;;  %vm126_vm7 = vcmask 5120  }
  0x11   :  { %v113_v8 = vld [vmem:[%s610_s1] sm:$0x3f]  ;;  %86 = vst.msk [vmem:[#allocation3] sm:$0xff] %vm84_vm3, %v474_v12  ;;  %vm194_vm12 = vcmask 1024   ;;  %v246_v50 = vld [vmem:[#allocation9] sm:$0xf] }
  0x12   :  { %v114_v9 = vsub.f32 %v112_v7, %v113_v8  ;;  %v120_v34 = vld [vmem:[%s611_s2] sm:$0x3f]  ;;  %vm124_vm6 = vcmp.lt.s32.totalorder %v123_v33, 2  ;;  %vm138_vm8 = vcmp.ge.s32.totalorder %v123_v33, 2  ;;  %vm139_vm9 = vcmp.lt.s32.totalorder %v123_v33, 4  ;;  %s330_s16 = sshll.u32 %s620_s11, 4  ;;  %s331_s16 = int_to_ptr.hbm [resolvable:$true] %s330_s16 }
  0x13   :  { %vm140_vm10 = vmand %vm138_vm8, %vm139_vm9  ;;  %vm153_vm11 = vcmp.ge.s32.totalorder %v123_v33, 4  ;;  %v247_v54 = vmul.f32 %v246_v50, %v246_v50  ;;  %vm248_vm13 = vcmask 257024   ;;  %v87_v55 = vld [vmem:[%s617_s8] sm:$0xff]  ;;  %vm92_vm14 = vcmask 130048   ;;  %s475_s1 = smov [#allocation10]  }
  0x14   :  { %v115_v10 = vmul.f32 %v114_v9, %v114_v9  ;;  %v88_v56 = vld [vmem:[%s618_s9] sm:$0xff] }
  0x15   :  { %v249_v60 = vsel %vm248_vm13, %v247_v54, 0.0  ;;  %v89_v61 = vsub.f32 %v87_v55, %v88_v56 }
  0x16   :  { %v117_v11 = vsel %vm116_vm2, %v115_v10, 0.0 }
  0x17   :  { %224 = vperm.xlu1 %368, %v222_v5   ;;  %211 = vmax.xlane.f32.xlu0 %v210_v6  ;;  %v100_v63 = vmul.f32 %v89_v61, %v89_v61  ;;  %v91_v0 = vand.u32 2147483647, %v89_v61 }
  0x19   :  { %v93_v2 = vsel %vm92_vm14, %v91_v0, 0.0 }
  0x1f   :  { %118 = vadd.xlane.f32.xlu0 %v117_v11 }
  0x81   :  { %v185_v15 = vpop.permute.xlu1 %184 }
  0x82   :  { %vm186_vm4 = vcmp.eq.s32.totalorder %v181_v14, %v185_v15  ;;  %v170_v16 = vpop.xlane.xlu0 %169 }
  0x83   :  { %v342_v17 = vsel %vm186_vm4, 1.0, %v474_v12  ;;  %v171_v18 = vsub.f32 %v166_v1, %v170_v16 }
  0x84   :  { %v189_v19 = vmul.f32 %v342_v17, %v166_v1  ;;  %v101_v1 = vsel %vm92_vm14, %v100_v63, 0.0 }
  0x85   :  { %v172_v20 = vmul.f32 1.442695, %v171_v18 }
  0x86   :  { %v190_v21 = vsel %vm167_vm0, %v189_v19, 0.0 }
  0x87   :  { %191 = vadd.xlane.f32.xlu1 %v190_v21  ;;  %370 = vpow2.f32 %v172_v20 }
  0x89   :  { %v225_v27 = vpop.permute.xlu1 %224 }
  0x8a   :  { %v212_v22 = vpop.xlane.xlu0 %211  ;;  %vm226_vm5 = vcmp.eq.s32.totalorder %v181_v14, %v225_v27 }
  0x8b   :  { %v213_v23 = vsub.f32 %v208_v4, %v212_v22  ;;  %v343_v30 = vsel %vm226_vm5, 1.0, %v474_v12 }
  0x8c   :  { %v229_v31 = vmul.f32 %v343_v30, %v208_v4 }
  0x8d   :  { %v371_v24 = vpop.eup %370  ;;  %v214_v25 = vmul.f32 1.442695, %v213_v23 }
  0x8e   :  { %v174_v26 = vsel %vm167_vm0, %v371_v24, 0.0  ;;  %v230_v32 = vsel %vm209_vm1, %v229_v31, 0.0 }
  0x8f   :  { %372 = vpow2.f32 %v214_v25  ;;  %175 = vadd.xlane.f32.xlu2 %v174_v26 }
  0x92   :  { %v119_v35 = vpop.xlane.xlu0 %118 }
  0x93   :  { %v121_v36 = vmul.f32 %v120_v34, %v119_v35 }
  0x95   :  { %v373_v28 = vpop.eup %372  ;;  %v125_v37 = vsel %vm124_vm6, %v121_v36, 0.0  ;;  %v141_v39 = vsel %vm140_vm10, %v121_v36, 0.0  ;;  %v154_v40 = vsel %vm153_vm11, %v121_v36, 0.0 }
  0x96   :  { %v216_v29 = vsel %vm209_vm1, %v373_v28, 0.0  ;;  %v127_v38 = vsel %vm126_vm7, %v125_v37, 0.0  ;;  %v142_v41 = vsel %vm126_vm7, %v141_v39, 0.0  ;;  %v155_v42 = vsel %vm126_vm7, %v154_v40, 0.0  ;;  %v99_v39 = vld [vmem:[#allocation3] sm:$0xff]  ;;  %v90_v40 = vld [vmem:[#allocation2] sm:$0xff] }
  0x97   :  { %217 = vadd.xlane.f32.xlu2 %v216_v29  ;;  %128 = vadd.xlane.f32.xlu0 %v127_v38 }
  0x9f   :  { %231 = vadd.xlane.f32.xlu2 %v230_v32  ;;  %156 = vadd.xlane.f32.xlu0 %v155_v42 }
  0xa7   :  { %143 = vadd.xlane.f32.xlu2 %v142_v41 }
  0xfa   :  { %v192_v47 = vpop.xlane.xlu1 %191 }
 0x102   :  { %v176_v43 = vpop.xlane.xlu2 %175 }
 0x103   :  { %374 = vlog2.f32 %v176_v43 }
 0x109   :  { %v375_v44 = vpop.eup %374 }
 0x10a   :  { %v178_v45 = vmul.f32 0.6931472, %v375_v44  ;;  %v218_v46 = vpop.xlane.xlu2 %217  ;;  %v129_v3 = vpop.xlane.xlu0 %128 }
 0x10b   :  { %376 = vlog2.f32 %v218_v46  ;;  %v130_v4 = vrot.slane %v129_v3, 4 }
 0x10c   :  { %v179_v48 = vadd.f32 %v178_v45, %v170_v16 }
 0x10d   :  { %v131_v5 = vadd.f32 %v130_v4, %v129_v3 }
 0x10e   :  { %v193_v49 = vsub.f32 %v179_v48, %v192_v47 }
 0x10f   :  { %v132_v6 = vrot.slane %v131_v5, 2 }
 0x110   :  { %v195_v51 = vsel %vm194_vm12, %v193_v49, 0.0 }
 0x111   :  { %v377_v52 = vpop.eup %376  ;;  %196 = vadd.xlane.f32.xlu2 %v195_v51  ;;  %v133_v7 = vadd.f32 %v132_v6, %v131_v5  ;;  %v275_v51 = vld [vmem:[%s619_s10] sm:$0xff] }
 0x112   :  { %v220_v53 = vmul.f32 0.6931472, %v377_v52  ;;  %v232_v58 = vpop.xlane.xlu2 %231  ;;  %v157_v9 = vpop.xlane.xlu0 %156 }
 0x113   :  { %v158_v11 = vrot.slane %v157_v9, 4  ;;  %v134_v12 = vrot.slane %v133_v7, 1 }
 0x114   :  { %v221_v57 = vadd.f32 %v220_v53, %v212_v22 }
 0x115   :  { %v159_v14 = vadd.f32 %v158_v11, %v157_v9  ;;  %v135_v15 = vadd.f32 %v134_v12, %v133_v7 }
 0x116   :  { %v233_v59 = vsub.f32 %v221_v57, %v232_v58 }
 0x117   :  { %v160_v17 = vrot.slane %v159_v14, 2  ;;  %344 = vpush %v135_v15 }
 0x118   :  { %v234_v62 = vsel %vm194_vm12, %v233_v59, 0.0 }
 0x119   :  { %250 = vadd.xlane.f32.xlu2 %v249_v60  ;;  %235 = vadd.xlane.f32.xlu0 %v234_v62  ;;  %v161_v19 = vadd.f32 %v160_v17, %v159_v14 }
 0x11a   :  { %v144_v8 = vpop.xlane.xlu2 %143 }
 0x11b   :  { %v145_v10 = vrot.slane %v144_v8, 4  ;;  %v162_v21 = vrot.slane %v161_v19, 1 }
 0x11d   :  { %v146_v13 = vadd.f32 %v145_v10, %v144_v8  ;;  %v163_v23 = vadd.f32 %v162_v21, %v161_v19 }
 0x11f   :  { %v147_v16 = vrot.slane %v146_v13, 2 }
 0x121   :  { %102 = vadd.xlane.f32.xlu2 %v101_v1  ;;  %94 = vadd.xlane.f32.xlu0 %v93_v2  ;;  %v148_v18 = vadd.f32 %v147_v16, %v146_v13 }
 0x123   :  { %v149_v20 = vrot.slane %v148_v18, 1 }
 0x125   :  { %v150_v22 = vadd.f32 %v149_v20, %v148_v18 }
 0x127   :  { %346 = vpush %v150_v22 }
 0x128   :  { %348 = vpush %v163_v23 }
 0x148   :  { %s576_s8 = spop %344 }
 0x149   :  { %312 = sst [smem:[#allocation10 + $0x2]] %s576_s8 }
 0x158   :  { %s579_s9 = spop %346 }
 0x159   :  { %314 = sst [smem:[#allocation10 + $0x3]] %s579_s9  ;;  %s582_s19 = spop %348 }
 0x15a   :  { %316 = sst [smem:[#allocation10 + $0x4]] %s582_s19 }
 0x184   :  { %v197_v24 = vpop.xlane.xlu2 %196 }
 0x185   :  { %v198_v25 = vrot.slane %v197_v24, 4 }
 0x187   :  { %v199_v26 = vadd.f32 %v198_v25, %v197_v24 }
 0x189   :  { %v200_v27 = vrot.slane %v199_v26, 2 }
 0x18b   :  { %v201_v28 = vadd.f32 %v200_v27, %v199_v26 }
 0x18c   :  { %v251_v29 = vpop.xlane.xlu2 %250  ;;  %v236_v30 = vpop.xlane.xlu0 %235 }
 0x18d   :  { %v252_v31 = vrot.slane %v251_v29, 4  ;;  %v237_v32 = vrot.slane %v236_v30, 4  ;;  %v202_v33 = vrot.slane %v201_v28, 1 }
 0x18f   :  { %v253_v34 = vadd.f32 %v252_v31, %v251_v29  ;;  %v238_v35 = vadd.f32 %v237_v32, %v236_v30  ;;  %v203_v36 = vadd.f32 %v202_v33, %v201_v28 }
 0x191   :  { %v254_v37 = vrot.slane %v253_v34, 2  ;;  %v239_v38 = vrot.slane %v238_v35, 2  ;;  %350 = vpush %v203_v36 }
 0x193   :  { %v240_v41 = vadd.f32 %v239_v38, %v238_v35  ;;  %v255_v42 = vadd.f32 %v254_v37, %v253_v34 }
 0x194   :  { %v103_v43 = vpop.xlane.xlu2 %102  ;;  %v95_v44 = vpop.xlane.xlu0 %94 }
 0x195   :  { %v104_v45 = vadd.f32 %v103_v43, %v99_v39  ;;  %v96_v46 = vadd.f32 %v95_v44, %v90_v40  ;;  %v241_v47 = vrot.slane %v240_v41, 1  ;;  %v256_v48 = vrot.slane %v255_v42, 1 }
 0x197   :  { %105 = vst.msk [vmem:[#allocation3] sm:$0xff] %vm84_vm3, %v104_v45  ;;  %v242_v49 = vadd.f32 %v241_v47, %v240_v41  ;;  %v257_v50 = vadd.f32 %v256_v48, %v255_v42 }
 0x198   :  { %98 = vst.msk [vmem:[#allocation2] sm:$0xff] %vm84_vm3, %v96_v46 }
 0x199   :  { %352 = vpush %v242_v49 }
 0x19a   :  { %354 = vpush %v257_v50 }
 0x19e   :  { %v288_v52 = vld [vmem:[#allocation3] sm:$0xff] }
 0x19f   :  { %v289_v53 = vmul.f32 %v288_v52, %v275_v51  ;;  %v276_v54 = vld [vmem:[#allocation2] sm:$0xff] }
 0x1a0   :  { %v277_v55 = vmul.f32 %v276_v54, %v275_v51 }
 0x1a1   :  { %v290_v56 = vsel %vm84_vm3, %v289_v53, 0.0 }
 0x1a2   :  { %291 = vadd.xlane.f32.xlu2 %v290_v56  ;;  %v278_v57 = vsel %vm84_vm3, %v277_v55, 0.0 }
 0x1a3   :  { %279 = vadd.xlane.f32.xlu0 %v278_v57 }
 0x1c2   :  { %s351_s22 = spop %350 }
 0x1c3   :  { %s205_s23 = smul.f32 0.5, %s351_s22 }
 0x1c5   :  { %s592_s24 = smul.f32 0.00025, %s205_s23 }
 0x1c7   :  { %308 = sst [smem:[#allocation10]] %s592_s24 }
 0x1ca   :  { %s595_s25 = spop %352 }
 0x1cb   :  { %s244_s10 = smul.f32 0.5, %s595_s25  ;;  %s355_s26 = spop %354 }
 0x1cc   :  { %v259_v58 = vstv %s355_s26 }
 0x1cd   :  { %322 = sst [smem:[#allocation10 + $0x7]] %s244_s10  ;;  %378 = vrsqrt.f32 %v259_v58  ;;  %vm267_vm15 = vcmp.eq.f32.partialorder %v259_v58, inf  ;;  %v270_v2 = vand.u32 2147483648, %v259_v58  ;;  %vm269_vm0 = vcmp.eq.f32.partialorder %v259_v58, 0.0 }
 0x1d3   :  { %v379_v59 = vpop.eup %378 }
 0x1d4   :  { %v261_v60 = vmul.f32 %v379_v59, %v259_v58 }
 0x1d6   :  { %v262_v61 = vmul.f32 %v379_v59, %v261_v60 }
 0x1d8   :  { %v263_v62 = vmul.f32 0.5, %v262_v61 }
 0x1da   :  { %v264_v63 = vsub.f32 1.5, %v263_v62 }
 0x1dc   :  { %v265_v0 = vmul.f32 %v379_v59, %v264_v63 }
 0x1de   :  { %v266_v1 = vmul.f32 %v265_v0, %v259_v58 }
 0x1e0   :  { %v268_v3 = vsel %vm267_vm15, %v259_v58, %v266_v1 }
 0x1e1   :  { %v271_v4 = vsel %vm269_vm0, %v270_v2, %v268_v3 }
 0x1e2   :  { %356 = vpush %v271_v4 }
 0x213   :  { %s357_s27 = spop %356 }
 0x214   :  { %s273_s28 = smul.f32 0.001, %s357_s27 }
 0x215   :  { %v292_v5 = vpop.xlane.xlu2 %291 }
 0x216   :  { %v293_v6 = vrot.slane %v292_v5, 4  ;;  %v280_v7 = vpop.xlane.xlu0 %279  ;;  %310 = sst [smem:[#allocation10 + $0x1]] %s273_s28 }
 0x217   :  { %v281_v8 = vrot.slane %v280_v7, 4  ;;  %s300_s29 = sadd.f32 %s273_s28, %s592_s24 }
 0x218   :  { %v294_v9 = vadd.f32 %v293_v6, %v292_v5 }
 0x219   :  { %v282_v10 = vadd.f32 %v281_v8, %v280_v7  ;;  %s301_s5 = sadd.f32 %s576_s8, %s300_s29 }
 0x21a   :  { %v295_v11 = vrot.slane %v294_v9, 2 }
 0x21b   :  { %v283_v12 = vrot.slane %v282_v10, 2  ;;  %s302_s30 = sadd.f32 %s579_s9, %s301_s5 }
 0x21c   :  { %v296_v13 = vadd.f32 %v295_v11, %v294_v9 }
 0x21d   :  { %v284_v14 = vadd.f32 %v283_v12, %v282_v10  ;;  %s303_s3 = sadd.f32 %s582_s19, %s302_s30 }
 0x21e   :  { %v297_v15 = vrot.slane %v296_v13, 1 }
 0x21f   :  { %v285_v16 = vrot.slane %v284_v14, 1 }
 0x220   :  { %v298_v17 = vadd.f32 %v297_v15, %v296_v13 }
 0x221   :  { %v286_v18 = vadd.f32 %v285_v16, %v284_v14 }
 0x223   :  { %358 = vpush %v286_v18 }
 0x224   :  { %360 = vpush %v298_v17 }
 0x254   :  { %s359_s12 = spop %358 }
 0x255   :  { %s304_s7 = sadd.f32 %s359_s12, %s303_s3  ;;  %s361_s13 = spop %360 }
 0x256   :  { %318 = sst [smem:[#allocation10 + $0x5]] %s359_s12 }
 0x257   :  { %s305_s4 = sadd.f32 %s361_s13, %s304_s7 }
 0x258   :  { %320 = sst [smem:[#allocation10 + $0x6]] %s361_s13 }
 0x259   :  { %s306_s0 = sadd.f32 %s305_s4, %s244_s10 }
 0x25b   :  { %324 = sst [smem:[#allocation10 + $0x8]] %s306_s0 }
 0x25c   :  { %333 = dma.smem_to_hbm %s475_s1, 16, %s331_s16, [#allocation6]  }
 0x25d   :  { %468 = dma.done.wait [#allocation6], 16  }
 0x25e   :  { %469 = vsyncadd [#allocation6], 4294967280 }
 0x25f   :  { %338 = sfence }
 0x260   :  { %339 = vsyncpa [#allocation5], 1 }
 0x261   :  { %340 = vsyncpa [#allocation8], 1 }
 0x262   :  { %341 = vsyncpa [#allocation6], 1 }

</bundles_post_ra>
